<compile_context>
chip_gen: v5e
topology: v5e:2x2
jax: 0.10.0
libtpu: 0.0.40
codegen_flags: <defaults>
</compile_context>

<pallas_src>
import jax
import jax.numpy as jnp
from jax.experimental import pallas as pl
from jax.experimental.pallas import tpu as pltpu


def _round_up(x, m):
    return ((x + m - 1) // m) * m


def _vmem_capacity_bytes():
    """Generation-aware VMEM capacity (v5e/v6e: 128 MiB, v7x: 64 MiB per TC)."""
    try:
        return int(pltpu.get_tpu_info().vmem_capacity_bytes)
    except Exception:
        return 64 * 1024 * 1024  # conservative fallback (v7x per-TC)


def _build_weight(weight):
    """SuperCRLayer.build_weight(): abs -> column-normalize -> row-normalize."""
    w = jnp.abs(weight)
    w = w / jnp.sum(w, axis=0, keepdims=True)  # divide by column sums
    w = w / jnp.sum(w, axis=1, keepdims=True)  # divide by row sums of col-normed w
    return w


def _matmul_kernel(wt_ref, x_ref, o_ref):
    """Per grid step: y_tile = x_tile @ w_norm^T (weight already normalized)."""
    o_ref[...] = jnp.dot(
        x_ref[...], wt_ref[...], preferred_element_type=jnp.float32
    ).astype(o_ref.dtype)


def _choose_row_tile(bp, npk, itemsize, vmem_capacity):
    """Row tile from a generation-aware VMEM budget, capped for the HBM roofline."""
    budget = int(0.40 * vmem_capacity)
    weight_bytes = npk * npk * itemsize
    avail = max(budget - weight_bytes, 1 << 20)
    tb = avail // (4 * npk * itemsize)  # 2 (double-buffered) tiles each for x and out
    tb = max(8, (tb // 8) * 8)
    tb = min(tb, 1024)                  # HBM roofline saturates ~512-1024-row tiles
    if bp >= 1024:
        # Guarantee >=4 grid steps so "parallel" shards row tiles across v7x's 2 TCs.
        tb = min(tb, _round_up(pl.cdiv(bp, 4), 8))
    else:
        tb = min(tb, _round_up(bp, 8))  # single step for small batches
    return tb


def supercr_forward(x, weight):
    """Pallas implementation of SuperCRLayer.forward.

    x:      (..., n_waveguides) real array
    weight: (n_waveguides, n_waveguides) raw (pre-reparametrization) weight
    """
    n = weight.shape[0]
    assert weight.shape == (n, n)
    assert x.shape[-1] == n

    orig_shape = x.shape
    x2 = x.reshape(-1, n)
    b = x2.shape[0]

    # --- build_weight() in plain JAX (32x32, XLA fuses; no extra kernel launch) ---
    # torch: weight = build_weight().to(x.dtype); y = x @ weight.t()
    wt = _build_weight(weight).astype(x.dtype).T

    # --- lane-dense packing: fold `pack` logical rows into one 128-wide row ---
    # TODO(synk): on v6e/v7x packing to 256 lanes (native 256-wide MXU) is a
    # possible further (modest, memory-bound) win; 128 is kept as the portable
    # choice that is lane-dense on every generation.
    pack = 128 // n if (n < 128 and 128 % n == 0) else 1

    if pack > 1:
        b_rows = _round_up(b, pack)
        if b_rows != b:  # at most ONE pad, skipped when batch divides evenly
            x2 = jnp.pad(x2, ((0, b_rows - b), (0, 0)))
        xp = x2.reshape(b_rows // pack, pack * n)  # contiguous -> bitcast, no copy
        # block-diagonal (pack*n, pack*n) matrix with w_norm^T on the diagonal
        wt_use = jnp.kron(jnp.eye(pack, dtype=wt.dtype), wt)
    else:
        b_rows = b
        xp = x2
        wt_use = wt

    bp, npk = xp.shape
    itemsize = jnp.dtype(x.dtype).itemsize
    vmem_cap = _vmem_capacity_bytes()
    tb = _choose_row_tile(bp, npk, itemsize, vmem_cap)

    # No pad-to-tile-multiple and no output slice: cdiv grid; ragged last block's
    # OOB input rows are garbage (harmless, row-wise matmul) and OOB output rows
    # are dropped by Pallas.
    out = pl.pallas_call(
        _matmul_kernel,
        out_shape=jax.ShapeDtypeStruct((bp, npk), x.dtype),
        grid_spec=pl.GridSpec(
            grid=(pl.cdiv(bp, tb),),
            in_specs=[
                pl.BlockSpec((npk, npk), lambda i: (0, 0)),  # weight: VMEM-resident
                pl.BlockSpec((tb, npk), lambda i: (i, 0)),   # row tile of packed x
            ],
            out_specs=pl.BlockSpec((tb, npk), lambda i: (i, 0)),
        ),
        compiler_params=pltpu.CompilerParams(
            dimension_semantics=("parallel",),
            vmem_limit_bytes=min(int(0.45 * vmem_cap), 128 * 1024 * 1024),
        ),
    )(wt_use, xp)

    if pack > 1:
        out = out.reshape(b_rows, n)   # contiguous -> bitcast, no copy
        if b_rows != b:
            out = out[:b]
    return out.reshape(orig_shape)


def init_supercr_weight(key, n_waveguides):
    """noisy_identity init from SuperCRLayer.reset_parameters."""
    margin = 0.3
    eye = jnp.eye(n_waveguides, dtype=jnp.float32)
    w = eye * (margin - (1.0 - margin) / (n_waveguides - 1)) + (1.0 - margin) / (
        n_waveguides - 1
    )
    w = w + 0.05 * jax.random.normal(key, (n_waveguides, n_waveguides), jnp.float32)
    return w


def _reference_forward(x, weight):
    """Plain-JAX reference matching the torch forward, for a correctness check."""
    w = jnp.abs(weight)
    w = w / jnp.sum(w, axis=0, keepdims=True)
    w = w / jnp.sum(w, axis=1, keepdims=True)
    return jnp.matmul(x, w.T)


if __name__ == "__main__":
    key = jax.random.PRNGKey(0)
    k_w, k_x = jax.random.split(key)

    n_waveguides = 32
    # x: (batch=4, seq=32, n_waveguides=32) -> 128 logical rows, packed to (32, 128)
    x = jax.random.normal(k_x, (4, 32, n_waveguides), jnp.float32)
    weight = init_supercr_weight(k_w, n_waveguides)

    y = jax.block_until_ready(supercr_forward(x, weight))

    y_ref = _reference_forward(x, weight)
    assert y.shape == x.shape
    max_err = float(jnp.max(jnp.abs(y - y_ref)))
    assert jnp.allclose(y, y_ref, atol=1e-4, rtol=1e-4), max_err

    print("KERNEL_OK")
</pallas_src>

<mosaic_0001>
module attributes {stable_mosaic.version = 11 : i64} {
  func.func @_matmul_kernel(%arg0: i32, %arg1: memref<128x128xf32, #tpu.memory_space<vmem>>, %arg2: memref<32x128xf32, #tpu.memory_space<vmem>>, %arg3: memref<32x128xf32, #tpu.memory_space<vmem>>) attributes {dimension_semantics = [#tpu.dimension_semantics<parallel>], iteration_bounds = array<i64: 1>, scalar_prefetch = 0 : i64, scratch_operands = 0 : i64, tpu.core_type = #tpu.core_type<tc>, window_params = [{pipeline_mode = #tpu.pipeline_mode<synchronous>, transform_indices = @transform_0, window_bounds = array<i64: 128, 128>}, {transform_indices = @transform_1, window_bounds = array<i64: 32, 128>}, {transform_indices = @transform_2, window_bounds = array<i64: 32, 128>}]} {
    %c0 = arith.constant 0 : index
    %c0_0 = arith.constant 0 : index
    %0 = vector.load %arg2[%c0, %c0_0] : memref<32x128xf32, #tpu.memory_space<vmem>>, vector<32x128xf32>
    %c0_1 = arith.constant 0 : index
    %c0_2 = arith.constant 0 : index
    %1 = vector.load %arg1[%c0_1, %c0_2] : memref<128x128xf32, #tpu.memory_space<vmem>>, vector<128x128xf32>
    %cst = arith.constant dense<0.000000e+00> : vector<32x128xf32>
    %2 = tpu.matmul %0, %1, %cst {dimension_numbers = #tpu.dot_dimension_numbers<[1], [0], [0], [1], [0, 0, 1, 1], [], []>} : vector<32x128xf32>, vector<128x128xf32>, vector<32x128xf32> -> vector<32x128xf32>
    %c0_3 = arith.constant 0 : index
    %c0_4 = arith.constant 0 : index
    %3 = vector.load %arg3[%c0_3, %c0_4] : memref<32x128xf32, #tpu.memory_space<vmem>>, vector<32x128xf32>
    tpu.vector_store %arg3[%c0_3, %c0_4], %2 {strides = array<i32>} : memref<32x128xf32, #tpu.memory_space<vmem>>, vector<32x128xf32>,
    return
  }
  func.func @transform_0(%arg0: i32) -> (i32, i32) {
    %c0_i32 = arith.constant 0 : i32
    %c0_i32_0 = arith.constant 0 : i32
    %c0_i32_1 = arith.constant 0 : i32
    return %c0_i32, %c0_i32_0 : i32, i32
  }
  func.func @transform_1(%arg0: i32) -> (i32, i32) {
    %c0_i32 = arith.constant 0 : i32
    %c0_i32_0 = arith.constant 0 : i32
    return %arg0, %c0_i32 : i32, i32
  }
  func.func @transform_2(%arg0: i32) -> (i32, i32) {
    %c0_i32 = arith.constant 0 : i32
    %c0_i32_0 = arith.constant 0 : i32
    return %arg0, %c0_i32 : i32, i32
  }
}

</mosaic_0001>

<bundles_post_ra>
// kernel: tpu_custom_call.1
= control target key start
LH: loop header
LB: loop body
LE: loop exit
PB: predicated region body
PF: predicated region fallthrough
CT: control target
= control target key end

     0   :  { %7 = vsyncpa [#allocation3], 0  ;;  %s286_s0 = inlined_call_operand.hbm [shape: f32[128,128], index: 0, kind: input, shape index: {}]   ;;  %s287_s1 = inlined_call_operand.hbm [shape: f32[32,128], index: 1, kind: input, shape index: {}]   ;;  %s288_s2 = inlined_call_operand.hbm [shape: f32[32,128], index: 2, kind: output, shape index: {}]  }
   0x1   :  { %8 = vsyncpa [#allocation6], 0 }
   0x2   :  { %9 = vsyncpa [#allocation4], 0  ;;  %s14_s11 = sshll.u32 %s286_s0, 4  ;;  %s248_s12 = smov [#allocation2]   ;;  %s15_s11 = int_to_ptr.hbm [resolvable:$true] %s14_s11 }
   0x3   :  { %s16_s13 = sshll.u32 %s248_s12, 4  ;;  %s27_s16 = sshll.u32 %s287_s1, 4  ;;  %s17_s13 = int_to_ptr.vmem [resolvable:$true] %s16_s13  ;;  %s28_s16 = int_to_ptr.hbm [resolvable:$true] %s27_s16 }
   0x4   :  { %s249_s17 = smov 128   ;;  %s250_s18 = smov 8  }
   0x5   :  { %22 = dma.hbm_to_vmem [thread:$0]  %s15_s11, 2048, %s17_s13, [#allocation3], %s249_s17, %s249_s17, %s250_s18  }
   0x6   :  { %s251_s19 = smov [#allocation5]  }
   0x7   :  { %s29_s20 = sshll.u32 %s251_s19, 4  ;;  %s30_s20 = int_to_ptr.vmem [resolvable:$true] %s29_s20 }
   0x8   :  { %35 = dma.hbm_to_vmem [thread:$0]  %s28_s16, 512, %s30_s20, [#allocation6], %s249_s17, %s249_s17, %s250_s18  }
   0x9   :  { %242 = dma.done.wait [#allocation3], 2048  }
   0xa   :  { %243 = vsyncadd [#allocation3], 4294965248 }
   0xb   :  { %244 = dma.done.wait [#allocation6], 512  }
   0xc   :  { %245 = vsyncadd [#allocation6], 4294966784  ;;  %v63_v0 = vld [vmem:[#allocation2 + $0x78] sm:$0xff]  ;;  %v62_v1 = vld [vmem:[#allocation2 + $0x70] sm:$0xff]  ;;  %s252_s0 = smov [#allocation7]   ;;  %s103_s23 = sshll.u32 %s288_s2, 4  ;;  %s104_s23 = int_to_ptr.hbm [resolvable:$true] %s103_s23 }
   0xd   :  { %118 = vmatpush.msra.mxu2 %v63_v0  ;;  %119 = vmatpush.msra.mxu3 %v63_v0  ;;  %v61_v2 = vld [vmem:[#allocation2 + $0x68] sm:$0xff]  ;;  %v60_v3 = vld [vmem:[#allocation2 + $0x60] sm:$0xff]  ;;  %v59_v4 = vld [vmem:[#allocation2 + $0x58] sm:$0xff]  ;;  %s101_s1 = sshll.u32 %s252_s0, 4  ;;  %s102_s1 = int_to_ptr.vmem [resolvable:$true] %s101_s1 }
   0xe   :  { %64 = vmatpush.msra.mxu0 %v63_v0  ;;  %117 = vmatpush.msra.mxu1 %v63_v0  ;;  %v58_v5 = vld [vmem:[#allocation2 + $0x50] sm:$0xff]  ;;  %v57_v6 = vld [vmem:[#allocation2 + $0x48] sm:$0xff]  ;;  %v56_v7 = vld [vmem:[#allocation2 + $0x40] sm:$0xff] }
   0xf   :  { %121 = vmatpush.msra.mxu2 %v62_v1  ;;  %122 = vmatpush.msra.mxu3 %v62_v1  ;;  %v55_v8 = vld [vmem:[#allocation2 + $0x38] sm:$0xff]  ;;  %v54_v9 = vld [vmem:[#allocation2 + $0x30] sm:$0xff]  ;;  %v53_v10 = vld [vmem:[#allocation2 + $0x28] sm:$0xff] }
  0x10   :  { %65 = vmatpush.msra.mxu0 %v62_v1  ;;  %120 = vmatpush.msra.mxu1 %v62_v1  ;;  %v52_v11 = vld [vmem:[#allocation2 + $0x20] sm:$0xff]  ;;  %v51_v12 = vld [vmem:[#allocation2 + $0x18] sm:$0xff]  ;;  %v50_v13 = vld [vmem:[#allocation2 + $0x10] sm:$0xff] }
  0x11   :  { %124 = vmatpush.msra.mxu2 %v61_v2  ;;  %125 = vmatpush.msra.mxu3 %v61_v2  ;;  %v49_v14 = vld [vmem:[#allocation2 + $0x8] sm:$0xff]  ;;  %v48_v15 = vld [vmem:[#allocation2] sm:$0xff]  ;;  %v46_v16 = vld [vmem:[#allocation5 + $0x10] sm:$0xff] }
  0x12   :  { %66 = vmatpush.msra.mxu0 %v61_v2  ;;  %123 = vmatpush.msra.mxu1 %v61_v2  ;;  %v47_v17 = vld [vmem:[#allocation5 + $0x18] sm:$0xff]  ;;  %v44_v18 = vld [vmem:[#allocation5] sm:$0xff]  ;;  %v45_v19 = vld [vmem:[#allocation5 + $0x8] sm:$0xff] }
  0x13   :  { %127 = vmatpush.msra.mxu2 %v60_v3  ;;  %128 = vmatpush.msra.mxu3 %v60_v3 }
  0x14   :  { %67 = vmatpush.msra.mxu0 %v60_v3  ;;  %126 = vmatpush.msra.mxu1 %v60_v3 }
  0x15   :  { %130 = vmatpush.msra.mxu2 %v59_v4  ;;  %131 = vmatpush.msra.mxu3 %v59_v4 }
  0x16   :  { %68 = vmatpush.msra.mxu0 %v59_v4  ;;  %129 = vmatpush.msra.mxu1 %v59_v4 }
  0x17   :  { %133 = vmatpush.msra.mxu2 %v58_v5  ;;  %134 = vmatpush.msra.mxu3 %v58_v5 }
  0x18   :  { %69 = vmatpush.msra.mxu0 %v58_v5  ;;  %132 = vmatpush.msra.mxu1 %v58_v5 }
  0x19   :  { %136 = vmatpush.msra.mxu2 %v57_v6  ;;  %137 = vmatpush.msra.mxu3 %v57_v6 }
  0x1a   :  { %70 = vmatpush.msra.mxu0 %v57_v6  ;;  %135 = vmatpush.msra.mxu1 %v57_v6 }
  0x1b   :  { %139 = vmatpush.msra.mxu2 %v56_v7  ;;  %140 = vmatpush.msra.mxu3 %v56_v7 }
  0x1c   :  { %71 = vmatpush.msra.mxu0 %v56_v7  ;;  %138 = vmatpush.msra.mxu1 %v56_v7 }
  0x1d   :  { %142 = vmatpush.msra.mxu2 %v55_v8  ;;  %143 = vmatpush.msra.mxu3 %v55_v8 }
  0x1e   :  { %72 = vmatpush.msra.mxu0 %v55_v8  ;;  %141 = vmatpush.msra.mxu1 %v55_v8 }
  0x1f   :  { %145 = vmatpush.msra.mxu2 %v54_v9  ;;  %146 = vmatpush.msra.mxu3 %v54_v9 }
  0x20   :  { %73 = vmatpush.msra.mxu0 %v54_v9  ;;  %144 = vmatpush.msra.mxu1 %v54_v9 }
  0x21   :  { %148 = vmatpush.msra.mxu2 %v53_v10  ;;  %149 = vmatpush.msra.mxu3 %v53_v10 }
  0x22   :  { %74 = vmatpush.msra.mxu0 %v53_v10  ;;  %147 = vmatpush.msra.mxu1 %v53_v10 }
  0x23   :  { %151 = vmatpush.msra.mxu2 %v52_v11  ;;  %152 = vmatpush.msra.mxu3 %v52_v11 }
  0x24   :  { %75 = vmatpush.msra.mxu0 %v52_v11  ;;  %150 = vmatpush.msra.mxu1 %v52_v11 }
  0x25   :  { %154 = vmatpush.msra.mxu2 %v51_v12  ;;  %155 = vmatpush.msra.mxu3 %v51_v12 }
  0x26   :  { %76 = vmatpush.msra.mxu0 %v51_v12  ;;  %153 = vmatpush.msra.mxu1 %v51_v12 }
  0x27   :  { %157 = vmatpush.msra.mxu2 %v50_v13  ;;  %158 = vmatpush.msra.mxu3 %v50_v13 }
  0x28   :  { %77 = vmatpush.msra.mxu0 %v50_v13  ;;  %156 = vmatpush.msra.mxu1 %v50_v13 }
  0x29   :  { %160 = vmatpush.msra.mxu2 %v49_v14  ;;  %161 = vmatpush.msra.mxu3 %v49_v14 }
  0x2a   :  { %78 = vmatpush.msra.mxu0 %v49_v14  ;;  %159 = vmatpush.msra.mxu1 %v49_v14 }
  0x2b   :  { %163 = vmatpush.msra.mxu2 %v48_v15  ;;  %164 = vmatpush.msra.mxu3 %v48_v15 }
  0x2c   :  { %86 = vmatmul.f32.vlgmr.msra.gmra.mxu2 %v46_v16  ;;  %89 = vmatmul.f32.vlgmr.msra.gmra.mxu3 %v47_v17 }
  0x2d   :  { %79 = vmatpush.msra.mxu0 %v48_v15  ;;  %162 = vmatpush.msra.mxu1 %v48_v15 }
  0x2e   :  { %80 = vmatmul.f32.vlgmr.msra.gmra.mxu0 %v44_v18  ;;  %83 = vmatmul.f32.vlgmr.msra.gmra.mxu1 %v45_v19 }
  0xab   :  { %v81_v20 = vpop.f32.mrf.mxu0  ;;  %v84_v21 = vpop.f32.mrf.mxu1 }
  0xac   :  { %93 = vst [vmem:[#allocation7] sm:$0xff] %v81_v20 }
  0xad   :  { %94 = vst [vmem:[#allocation7 + $0x8] sm:$0xff] %v84_v21 }
  0xaf   :  { %v87_v22 = vpop.f32.mrf.mxu2  ;;  %v90_v23 = vpop.f32.mrf.mxu3 }
  0xb0   :  { %95 = vst [vmem:[#allocation7 + $0x10] sm:$0xff] %v87_v22 }
  0xb1   :  { %96 = vst [vmem:[#allocation7 + $0x18] sm:$0xff] %v90_v23 }
  0xb2   :  { %109 = dma.vmem_to_hbm [thread:$0]  %s102_s1, 512, %s104_s23, [#allocation4], %s249_s17, %s249_s17, %s250_s18  }
  0xb3   :  { %246 = dma.done.wait [#allocation4], 512  }
  0xb4   :  { %247 = vsyncadd [#allocation4], 4294966784 }
  0xb5   :  { %114 = vsyncpa [#allocation3], 1 }
  0xb6   :  { %115 = vsyncpa [#allocation6], 1 }
  0xb7   :  { %116 = vsyncpa [#allocation4], 1 }

</bundles_post_ra>
